<compile_context>
chip_gen: v7x
topology: tpu7x:2x2x1
jax: 0.10.0
libtpu: 0.0.40
codegen_flags: <defaults>
</compile_context>

<pallas_src>
import functools
import math

import jax
import jax.numpy as jnp
from jax.experimental import pallas as pl
from jax.experimental.pallas import tpu as pltpu

LANES = 128            # lane width of a vreg (last dim of the slab)
MAX_TILE_ROWS = 4096   # 4096 x 128 x 4B = 2 MiB per f32 tile


def _cdiv(a, b):
    return -(-a // b)


def _round_up(n, m):
    return ((n + m - 1) // m) * m


def _py_fmix32(h):
    """Python-side murmur3 finalizer (derives per-stream keys from the seed)."""
    h &= 0xFFFFFFFF
    h ^= h >> 16
    h = (h * 0x85EBCA6B) & 0xFFFFFFFF
    h ^= h >> 13
    h = (h * 0xC2B2AE35) & 0xFFFFFFFF
    h ^= h >> 16
    return h


def _fmix32(h):
    """In-kernel murmur3 finalizer (VPU-only fallback RNG for non-TPU runs)."""
    h = h ^ (h >> 16)
    h = h * jnp.uint32(0x85EBCA6B)
    h = h ^ (h >> 13)
    h = h * jnp.uint32(0xC2B2AE35)
    h = h ^ (h >> 16)
    return h


def _gaussian_noise_kernel(x_ref, o_ref, *, std, seed, key1, key2,
                           tile_rows, use_hw_prng):
    half = tile_rows // 2

    # ---- random bits: one (u32, u32) pair per output pair -------------------
    if use_hw_prng:
        # Re-seed per grid step -> streams are reproducible and independent of
        # execution order (safe with dimension_semantics=("parallel",)).
        pltpu.prng_seed(seed, pl.program_id(0))
        bits1 = pltpu.bitcast(pltpu.prng_random_bits((half, LANES)), jnp.uint32)
        bits2 = pltpu.bitcast(pltpu.prng_random_bits((half, LANES)), jnp.uint32)
    else:
        # Counter-based fallback (interpret / CPU): murmur3 fmix32 of the
        # global pair index, two decorrelated streams.
        row = jax.lax.broadcasted_iota(jnp.int32, (half, LANES), 0).astype(jnp.uint32)
        col = jax.lax.broadcasted_iota(jnp.int32, (half, LANES), 1).astype(jnp.uint32)
        base = (pl.program_id(0) * (half * LANES)).astype(jnp.uint32)
        pair_idx = base + row * jnp.uint32(LANES) + col
        h = pair_idx * jnp.uint32(0x9E3779B1)
        bits1 = _fmix32(h ^ jnp.uint32(key1))
        bits2 = _fmix32(h ^ jnp.uint32(key2))

    # ---- uniforms via the exponent trick: (bits>>9)|0x3F800000 -> [1, 2) ----
    one_exp = jnp.uint32(0x3F800000)
    f1 = jax.lax.bitcast_convert_type((bits1 >> 9) | one_exp, jnp.float32)
    f2 = jax.lax.bitcast_convert_type((bits2 >> 9) | one_exp, jnp.float32)
    u1 = jnp.float32(2.0) - f1                               # (0, 1]  -> log safe
    phi = jnp.float32(math.pi) * (f2 - jnp.float32(1.5))     # [-pi/2, pi/2)

    # ---- Box-Muller without generic trig ------------------------------------
    r = jnp.sqrt(jnp.float32(-2.0) * jnp.log(u1))            # log/sqrt -> EUP

    # sin(phi) via a degree-7 odd polynomial on [-pi/2, pi/2] (strictly |s|<1
    # there, so 1 - s^2 stays non-negative); cos(phi) = sqrt(1 - s^2) >= 0 on
    # that interval.  No range reduction, no VALU trig.
    p2 = phi * phi
    s = phi * (jnp.float32(1.0)
               + p2 * (jnp.float32(-1.0 / 6.0)
               + p2 * (jnp.float32(1.0 / 120.0)
               + p2 * jnp.float32(-1.0 / 5040.0))))
    c = jnp.sqrt(jnp.maximum(jnp.float32(1.0) - s * s, jnp.float32(0.0)))

    n_top = r * c
    n_bot = r * s

    # Random sign flip of BOTH outputs (spare low bit of bits2) maps the right
    # half-circle to the full circle -> (n_top, n_bot) are independent N(0,1).
    sgn = bits2 << jnp.uint32(31)
    n_top = jax.lax.bitcast_convert_type(
        jax.lax.bitcast_convert_type(n_top, jnp.uint32) ^ sgn, jnp.float32)
    n_bot = jax.lax.bitcast_convert_type(
        jax.lax.bitcast_convert_type(n_bot, jnp.uint32) ^ sgn, jnp.float32)

    # ---- apply: load each half of x right where it is consumed --------------
    s_std = jnp.float32(std)
    o_ref[:half, :] = (x_ref[:half, :].astype(jnp.float32)
                       + s_std * n_top).astype(o_ref.dtype)
    o_ref[half:, :] = (x_ref[half:, :].astype(jnp.float32)
                       + s_std * n_bot).astype(o_ref.dtype)


def _choose_tiling(total):
    """Pick (tile_rows, rows, needs_pad) for a lane-dense (rows, 128) slab."""
    rows_needed = _cdiv(total, LANES)
    cap = min(MAX_TILE_ROWS, _round_up(rows_needed, 16))
    if rows_needed >= 32:
        # Keep >= 2 grid steps so v7x can shard the "parallel" axis over both
        # TensorCores.
        cap = min(cap, max(16, (rows_needed // 2) // 16 * 16))
    tile_rows = cap
    needs_pad = (total % LANES != 0) or (rows_needed % tile_rows != 0)
    if needs_pad and total % LANES == 0:
        # Prefer a reasonably large exact divisor: skipping the whole-tensor
        # pad + slice saves a full extra HBM read+write pass.
        floor_t = max(16, (cap // 4) // 16 * 16)
        t = cap
        while t >= floor_t:
            if rows_needed % t == 0:
                tile_rows, needs_pad = t, False
                break
            t -= 16
    rows = _round_up(rows_needed, tile_rows)
    return tile_rows, rows, needs_pad


def gaussian_noise(x, std, seed=0):
    """X + normal(0, std), elementwise; same shape/dtype as X."""
    orig_shape = x.shape
    total = x.size
    tile_rows, rows, needs_pad = _choose_tiling(total)

    if needs_pad:
        # Fallback for ragged sizes.
        # TODO(synk): handle the ragged tail with a small separate kernel to
        # avoid the extra HBM pass from pad + slice.
        flat = jnp.pad(x.reshape(-1), (0, rows * LANES - total))
        x2d = flat.reshape(rows, LANES)
    else:
        x2d = x.reshape(rows, LANES)     # no extra HBM pass

    use_hw_prng = jax.default_backend() == "tpu"
    seed = int(seed) & 0x7FFFFFFF
    key1 = _py_fmix32(seed ^ 0x9E3779B9)
    key2 = _py_fmix32((seed ^ 0x7F4A7C15) + 0x632BE59B)

    kernel = functools.partial(
        _gaussian_noise_kernel,
        std=float(std), seed=seed, key1=key1, key2=key2,
        tile_rows=tile_rows, use_hw_prng=use_hw_prng)

    itemsize = jnp.dtype(x.dtype).itemsize
    out2d = pl.pallas_call(
        kernel,
        out_shape=jax.ShapeDtypeStruct((rows, LANES), x.dtype),
        grid=(rows // tile_rows,),
        in_specs=[pl.BlockSpec((tile_rows, LANES), lambda i: (i, 0))],
        out_specs=pl.BlockSpec((tile_rows, LANES), lambda i: (i, 0)),
        compiler_params=pltpu.CompilerParams(
            dimension_semantics=("parallel",),       # counter/step-seeded RNG -> independent steps
            vmem_limit_bytes=32 * 1024 * 1024,       # large tiles also fit on v5e
        ),
        cost_estimate=pl.CostEstimate(
            flops=20 * rows * LANES,
            transcendentals=2 * rows * LANES,
            bytes_accessed=2 * rows * LANES * itemsize,
        ),
    )(x2d)

    if needs_pad:
        return out2d.reshape(-1)[:total].reshape(orig_shape)
    return out2d.reshape(orig_shape)


if __name__ == "__main__":
    key = jax.random.PRNGKey(0)
    std = 0.1

    # Primary example consistent with an NCHW GaussianNoise input.
    B, C, H, W = 2, 4, 16, 16
    x = jax.random.normal(key, (B, C, H, W), dtype=jnp.float32)
    y = jax.block_until_ready(gaussian_noise(x, std, seed=42))

    assert y.shape == x.shape and y.dtype == x.dtype
    noise = y - x
    assert float(jnp.abs(jnp.mean(noise))) < 5.0 * std
    assert float(jnp.max(jnp.abs(noise))) < 10.0 * std
    sample_std = float(jnp.std(noise))
    assert 0.5 * std < sample_std < 1.5 * std

    # Multi-step grid path (no padding, >= 2 grid steps -> v7x dual-TC).
    x2 = jax.random.normal(jax.random.PRNGKey(1), (4, 8, 64, 64), dtype=jnp.float32)
    y2 = jax.block_until_ready(gaussian_noise(x2, std, seed=7))
    n2 = y2 - x2
    assert y2.shape == x2.shape and y2.dtype == x2.dtype
    assert float(jnp.abs(jnp.mean(n2))) < 5.0 * std
    assert 0.5 * std < float(jnp.std(n2)) < 1.5 * std

    # Ragged (non-lane-divisible) fallback path.
    x3 = jax.random.normal(jax.random.PRNGKey(2), (3, 5, 7, 11), dtype=jnp.float32)
    y3 = jax.block_until_ready(gaussian_noise(x3, std, seed=3))
    n3 = y3 - x3
    assert y3.shape == x3.shape and y3.dtype == x3.dtype
    assert 0.5 * std < float(jnp.std(n3)) < 1.5 * std

    print("KERNEL_OK")
</pallas_src>

<mosaic_0001>
module attributes {stable_mosaic.version = 11 : i64} {
  func.func @_gaussian_noise_kernel(%arg0: i32, %arg1: memref<16x128xf32, #tpu.memory_space<vmem>>, %arg2: memref<16x128xf32, #tpu.memory_space<vmem>>) attributes {dimension_semantics = [#tpu.dimension_semantics<parallel>], iteration_bounds = array<i64: 1>, scalar_prefetch = 0 : i64, scratch_operands = 0 : i64, tpu.core_type = #tpu.core_type<tc>, window_params = [{transform_indices = @transform_0, window_bounds = array<i64: 16, 128>}, {transform_indices = @transform_1, window_bounds = array<i64: 16, 128>}]} {
    %0 = tpu.iota {dimensions = array<i32: 0>} : vector<8x128xi32>
    %1 = tpu.iota {dimensions = array<i32: 1>} : vector<8x128xi32>
    %c1024_i32 = arith.constant 1024 : i32
    %2 = arith.muli %arg0, %c1024_i32 : i32
    %c128_i32 = arith.constant 128 : i32
    %3 = vector.broadcast %c128_i32 : i32 to vector<8x128xi32>
    %4 = arith.muli %0, %3 : vector<8x128xi32>
    %5 = vector.broadcast %2 : i32 to vector<8x128xi32>
    %6 = arith.addi %5, %4 : vector<8x128xi32>
    %7 = arith.addi %6, %1 : vector<8x128xi32>
    %c-1640531535_i32 = arith.constant -1640531535 : i32
    %8 = vector.broadcast %c-1640531535_i32 : i32 to vector<8x128xi32>
    %9 = arith.muli %7, %8 : vector<8x128xi32>
    %c-438702384_i32 = arith.constant -438702384 : i32
    %10 = vector.broadcast %c-438702384_i32 : i32 to vector<8x128xi32>
    %11 = arith.xori %9, %10 : vector<8x128xi32>
    %c16_i32 = arith.constant 16 : i32
    %12 = vector.broadcast %c16_i32 : i32 to vector<8x128xi32>
    %13 = arith.shrui %11, %12 : vector<8x128xi32>
    %14 = arith.xori %11, %13 : vector<8x128xi32>
    %c-2048144789_i32 = arith.constant -2048144789 : i32
    %15 = vector.broadcast %c-2048144789_i32 : i32 to vector<8x128xi32>
    %16 = arith.muli %14, %15 : vector<8x128xi32>
    %c13_i32 = arith.constant 13 : i32
    %17 = vector.broadcast %c13_i32 : i32 to vector<8x128xi32>
    %18 = arith.shrui %16, %17 : vector<8x128xi32>
    %19 = arith.xori %16, %18 : vector<8x128xi32>
    %c-1028477387_i32 = arith.constant -1028477387 : i32
    %20 = vector.broadcast %c-1028477387_i32 : i32 to vector<8x128xi32>
    %21 = arith.muli %19, %20 : vector<8x128xi32>
    %c16_i32_0 = arith.constant 16 : i32
    %22 = vector.broadcast %c16_i32_0 : i32 to vector<8x128xi32>
    %23 = arith.shrui %21, %22 : vector<8x128xi32>
    %24 = arith.xori %21, %23 : vector<8x128xi32>
    %c-654019426_i32 = arith.constant -654019426 : i32
    %25 = vector.broadcast %c-654019426_i32 : i32 to vector<8x128xi32>
    %26 = arith.xori %9, %25 : vector<8x128xi32>
    %c16_i32_1 = arith.constant 16 : i32
    %27 = vector.broadcast %c16_i32_1 : i32 to vector<8x128xi32>
    %28 = arith.shrui %26, %27 : vector<8x128xi32>
    %29 = arith.xori %26, %28 : vector<8x128xi32>
    %c-2048144789_i32_2 = arith.constant -2048144789 : i32
    %30 = vector.broadcast %c-2048144789_i32_2 : i32 to vector<8x128xi32>
    %31 = arith.muli %29, %30 : vector<8x128xi32>
    %c13_i32_3 = arith.constant 13 : i32
    %32 = vector.broadcast %c13_i32_3 : i32 to vector<8x128xi32>
    %33 = arith.shrui %31, %32 : vector<8x128xi32>
    %34 = arith.xori %31, %33 : vector<8x128xi32>
    %c-1028477387_i32_4 = arith.constant -1028477387 : i32
    %35 = vector.broadcast %c-1028477387_i32_4 : i32 to vector<8x128xi32>
    %36 = arith.muli %34, %35 : vector<8x128xi32>
    %c16_i32_5 = arith.constant 16 : i32
    %37 = vector.broadcast %c16_i32_5 : i32 to vector<8x128xi32>
    %38 = arith.shrui %36, %37 : vector<8x128xi32>
    %39 = arith.xori %36, %38 : vector<8x128xi32>
    %c9_i32 = arith.constant 9 : i32
    %40 = vector.broadcast %c9_i32 : i32 to vector<8x128xi32>
    %41 = arith.shrui %24, %40 : vector<8x128xi32>
    %c1065353216_i32 = arith.constant 1065353216 : i32
    %42 = vector.broadcast %c1065353216_i32 : i32 to vector<8x128xi32>
    %43 = arith.ori %41, %42 : vector<8x128xi32>
    %44 = tpu.bitcast %43 : vector<8x128xi32> -> vector<8x128xf32>
    %c9_i32_6 = arith.constant 9 : i32
    %45 = vector.broadcast %c9_i32_6 : i32 to vector<8x128xi32>
    %46 = arith.shrui %39, %45 : vector<8x128xi32>
    %c1065353216_i32_7 = arith.constant 1065353216 : i32
    %47 = vector.broadcast %c1065353216_i32_7 : i32 to vector<8x128xi32>
    %48 = arith.ori %46, %47 : vector<8x128xi32>
    %49 = tpu.bitcast %48 : vector<8x128xi32> -> vector<8x128xf32>
    %cst = arith.constant 2.000000e+00 : f32
    %50 = vector.broadcast %cst : f32 to vector<8x128xf32>
    %51 = arith.subf %50, %44 : vector<8x128xf32>
    %cst_8 = arith.constant 1.500000e+00 : f32
    %52 = vector.broadcast %cst_8 : f32 to vector<8x128xf32>
    %53 = arith.subf %49, %52 : vector<8x128xf32>
    %cst_9 = arith.constant 3.14159274 : f32
    %54 = vector.broadcast %cst_9 : f32 to vector<8x128xf32>
    %55 = arith.mulf %54, %53 : vector<8x128xf32>
    %56 = math.log %51 : vector<8x128xf32>
    %cst_10 = arith.constant -2.000000e+00 : f32
    %57 = vector.broadcast %cst_10 : f32 to vector<8x128xf32>
    %58 = arith.mulf %57, %56 : vector<8x128xf32>
    %59 = math.sqrt %58 : vector<8x128xf32>
    %60 = arith.mulf %55, %55 : vector<8x128xf32>
    %cst_11 = arith.constant -1.98412701E-4 : f32
    %61 = vector.broadcast %cst_11 : f32 to vector<8x128xf32>
    %62 = arith.mulf %60, %61 : vector<8x128xf32>
    %cst_12 = arith.constant 0.00833333377 : f32
    %63 = vector.broadcast %cst_12 : f32 to vector<8x128xf32>
    %64 = arith.addf %63, %62 : vector<8x128xf32>
    %65 = arith.mulf %60, %64 : vector<8x128xf32>
    %cst_13 = arith.constant -0.166666672 : f32
    %66 = vector.broadcast %cst_13 : f32 to vector<8x128xf32>
    %67 = arith.addf %66, %65 : vector<8x128xf32>
    %68 = arith.mulf %60, %67 : vector<8x128xf32>
    %cst_14 = arith.constant 1.000000e+00 : f32
    %69 = vector.broadcast %cst_14 : f32 to vector<8x128xf32>
    %70 = arith.addf %69, %68 : vector<8x128xf32>
    %71 = arith.mulf %55, %70 : vector<8x128xf32>
    %72 = arith.mulf %71, %71 : vector<8x128xf32>
    %cst_15 = arith.constant 1.000000e+00 : f32
    %73 = vector.broadcast %cst_15 : f32 to vector<8x128xf32>
    %74 = arith.subf %73, %72 : vector<8x128xf32>
    %cst_16 = arith.constant 0.000000e+00 : f32
    %75 = vector.broadcast %cst_16 : f32 to vector<8x128xf32>
    %76 = arith.maximumf %74, %75 : vector<8x128xf32>
    %77 = math.sqrt %76 : vector<8x128xf32>
    %78 = arith.mulf %59, %77 : vector<8x128xf32>
    %79 = arith.mulf %59, %71 : vector<8x128xf32>
    %c31_i32 = arith.constant 31 : i32
    %80 = vector.broadcast %c31_i32 : i32 to vector<8x128xi32>
    %81 = arith.shli %39, %80 : vector<8x128xi32>
    %82 = tpu.bitcast %78 : vector<8x128xf32> -> vector<8x128xi32>
    %83 = arith.xori %82, %81 : vector<8x128xi32>
    %84 = tpu.bitcast %83 : vector<8x128xi32> -> vector<8x128xf32>
    %85 = tpu.bitcast %79 : vector<8x128xf32> -> vector<8x128xi32>
    %86 = arith.xori %85, %81 : vector<8x128xi32>
    %87 = tpu.bitcast %86 : vector<8x128xi32> -> vector<8x128xf32>
    %c0 = arith.constant 0 : index
    %c0_17 = arith.constant 0 : index
    %88 = vector.load %arg1[%c0, %c0_17] : memref<16x128xf32, #tpu.memory_space<vmem>>, vector<8x128xf32>
    %cst_18 = arith.constant 1.000000e-01 : f32
    %89 = vector.broadcast %cst_18 : f32 to vector<8x128xf32>
    %90 = arith.mulf %89, %84 : vector<8x128xf32>
    %91 = arith.addf %88, %90 : vector<8x128xf32>
    %c0_19 = arith.constant 0 : index
    %c0_20 = arith.constant 0 : index
    %92 = vector.load %arg2[%c0_19, %c0_20] : memref<16x128xf32, #tpu.memory_space<vmem>>, vector<8x128xf32>
    tpu.vector_store %arg2[%c0_19, %c0_20], %91 {strides = array<i32>} : memref<16x128xf32, #tpu.memory_space<vmem>>, vector<8x128xf32>,
    %c8 = arith.constant 8 : index
    %c0_21 = arith.constant 0 : index
    %93 = vector.load %arg1[%c8, %c0_21] : memref<16x128xf32, #tpu.memory_space<vmem>>, vector<8x128xf32>
    %cst_22 = arith.constant 1.000000e-01 : f32
    %94 = vector.broadcast %cst_22 : f32 to vector<8x128xf32>
    %95 = arith.mulf %94, %87 : vector<8x128xf32>
    %96 = arith.addf %93, %95 : vector<8x128xf32>
    %c8_23 = arith.constant 8 : index
    %c0_24 = arith.constant 0 : index
    %97 = vector.load %arg2[%c8_23, %c0_24] : memref<16x128xf32, #tpu.memory_space<vmem>>, vector<8x128xf32>
    tpu.vector_store %arg2[%c8_23, %c0_24], %96 {strides = array<i32>} : memref<16x128xf32, #tpu.memory_space<vmem>>, vector<8x128xf32>,
    return
  }
  func.func @transform_0(%arg0: i32) -> (i32, i32) {
    %c0_i32 = arith.constant 0 : i32
    %c0_i32_0 = arith.constant 0 : i32
    return %arg0, %c0_i32 : i32, i32
  }
  func.func @transform_1(%arg0: i32) -> (i32, i32) {
    %c0_i32 = arith.constant 0 : i32
    %c0_i32_0 = arith.constant 0 : i32
    return %arg0, %c0_i32 : i32, i32
  }
}

</mosaic_0001>

<bundles_post_ra>
// kernel: tpu_custom_call.1
= control target key start
LH: loop header
LB: loop body
LE: loop exit
PB: predicated region body
PF: predicated region fallthrough
CT: control target
= control target key end

     0   :  { %6 = vsyncpa [#allocation3], 0  ;;  %s225_s0 = inlined_call_operand.hbm [shape: f32[16,128], index: 0, kind: input, shape index: {}]   ;;  %s226_s1 = inlined_call_operand.hbm [shape: f32[16,128], index: 1, kind: output, shape index: {}]  }
   0x1   :  { %7 = vsyncpa [#allocation4], 0  ;;  %s181_s6 = smov [#allocation2]   ;;  %s133_s10 = scalar_lea.hbm %s225_s0, 256 }
   0x2   :  { %s13_s7 = sshll.u32 %s181_s6, 4  ;;  %p134_p0 = scmp.ne.s32.totalorder %s225_s0, %s133_s10  ;;  %s14_s7 = int_to_ptr.vmem [resolvable:$true] %s13_s7 }
   0x3   :  { %p137_p1 = scmp.lt.u32.totalorder %s133_s10, %s225_s0 }
   0x5   :  { %p139_p2 = pnand %p137_p1, %p134_p0 }
   0x7   :  { %142 = shalt.err (!%p139_p2)
}
   0x8   :  { %s143_s15 = scalar_lea.vmem %s14_s7, 256  ;;  %p148_p4 = scmp.lt.s32.totalorder %s14_s7, %s14_s7 }
   0x9   :  { %p144_p3 = scmp.ne.s32.totalorder %s14_s7, %s143_s15  ;;  %p149_p5 = scmp.lt.s32.totalorder %s143_s15, %s143_s15 }
   0xb   :  { %p150_p6 = por %p149_p5, %p148_p4 }
   0xd   :  { %p151_p7 = pnand %p150_p6, %p144_p3 }
   0xf   :  { %154 = shalt.err (!%p151_p7)
}
  0x10   :  { %s182_s16 = smov 128   ;;  %s183_s17 = smov 8  }
  0x11   :  { %19 = dma.hbm_to_vmem [thread:$0]  %s225_s0, 256, %s14_s7, [#allocation3], %s182_s16, %s182_s16, %s183_s17  }
  0x12   :  { %177 = dma.done.wait [#allocation3], 256  }
  0x13   :  { %178 = vsyncadd [#allocation3], 4294967040  ;;  %v23_v0 = vlaneseq  ;;  %v101_v53 = vld [vmem:[#allocation2 + $0x8] sm:$0xff]  ;;  %v97_v63 = vld [vmem:[#allocation2] sm:$0xff]  ;;  %s184_s0 = smov [#allocation5]  }
  0x14   :  { %s110_s20 = sshll.u32 %s184_s0, 4  ;;  %s111_s20 = int_to_ptr.vmem [resolvable:$true] %s110_s20 }
  0x15   :  { %v24_v1 = vshrl.u32 %v23_v0, 7  ;;  %v26_v2 = vand.u32 127, %v23_v0  ;;  %s155_s21 = scalar_lea.vmem %s111_s20, 256  ;;  %p160_p9 = scmp.lt.s32.totalorder %s111_s20, %s111_s20 }
  0x16   :  { %p156_p8 = scmp.ne.s32.totalorder %s111_s20, %s155_s21  ;;  %p161_p10 = scmp.lt.s32.totalorder %s155_s21, %s155_s21 }
  0x17   :  { %v28_v3 = vmul.u32 128, %v24_v1 }
  0x18   :  { %p162_p11 = por %p161_p10, %p160_p9 }
  0x19   :  { %v31_v4 = vadd.s32 %v28_v3, %v26_v2 }
  0x1a   :  { %p163_p12 = pnand %p162_p11, %p156_p8 }
  0x1b   :  { %v32_v5 = vmul.u32 2654435761, %v31_v4 }
  0x1d   :  { %v33_v6 = vxor.u32 3856264912, %v32_v5  ;;  %v42_v7 = vxor.u32 3640947870, %v32_v5 }
  0x1f   :  { %v34_v8 = vshrl.u32 %v33_v6, 16  ;;  %v43_v9 = vshrl.u32 %v42_v7, 16 }
  0x21   :  { %v35_v10 = vxor.u32 %v34_v8, %v33_v6  ;;  %v44_v11 = vxor.u32 %v43_v9, %v42_v7 }
  0x23   :  { %v36_v12 = vmul.u32 2246822507, %v35_v10  ;;  %v45_v13 = vmul.u32 2246822507, %v44_v11 }
  0x25   :  { %v37_v14 = vshrl.u32 %v36_v12, 13  ;;  %v46_v15 = vshrl.u32 %v45_v13, 13 }
  0x27   :  { %v38_v16 = vxor.u32 %v37_v14, %v36_v12  ;;  %v47_v17 = vxor.u32 %v46_v15, %v45_v13 }
  0x29   :  { %v39_v18 = vmul.u32 3266489909, %v38_v16  ;;  %v48_v19 = vmul.u32 3266489909, %v47_v17 }
  0x2b   :  { %v40_v20 = vshrl.u32 %v39_v18, 16  ;;  %v49_v21 = vshrl.u32 %v48_v19, 16 }
  0x2d   :  { %v41_v22 = vxor.u32 %v40_v20, %v39_v18  ;;  %v50_v23 = vxor.u32 %v49_v21, %v48_v19 }
  0x2f   :  { %v51_v24 = vshrl.u32 %v41_v22, 9  ;;  %v54_v25 = vshrl.u32 %v50_v23, 9  ;;  %v90_v49 = vshll.u32 %v50_v23, 31 }
  0x31   :  { %v52_v26 = vor.u32 1065353216, %v51_v24  ;;  %v55_v27 = vor.u32 1065353216, %v54_v25 }
  0x33   :  { %v57_v28 = vsub.f32 2.0, %v52_v26  ;;  %v122_v29 = vadd.f32 -1.5, %v55_v27 }
  0x35   :  { %v59_v30 = vmul.f32 3.1415927, %v122_v29  ;;  %127 = vlog2.f32 %v57_v28 }
  0x37   :  { %v70_v31 = vmul.f32 %v59_v30, %v59_v30 }
  0x39   :  { %v71_v32 = vmul.f32 -0.0001984127, %v70_v31 }
  0x3b   :  { %v72_v33 = vadd.f32 0.008333334, %v71_v32 }
  0x3d   :  { %v73_v34 = vmul.f32 %v72_v33, %v70_v31 }
  0x3f   :  { %v128_v35 = vpop.eup %127  ;;  %v74_v36 = vadd.f32 -0.16666667, %v73_v34 }
  0x40   :  { %v61_v37 = vmul.f32 0.6931472, %v128_v35 }
  0x41   :  { %v75_v38 = vmul.f32 %v74_v36, %v70_v31 }
  0x42   :  { %v62_v39 = vmul.f32 -2.0, %v61_v37 }
  0x43   :  { %v76_v40 = vadd.f32 1.0, %v75_v38 }
  0x44   :  { %129 = vrsqrt.f32 %v62_v39  ;;  %vm65_vm0 = vcmp.eq.f32.partialorder %v62_v39, inf  ;;  %v68_v46 = vand.u32 2147483648, %v62_v39  ;;  %vm67_vm1 = vcmp.eq.f32.partialorder %v62_v39, 0.0 }
  0x45   :  { %v77_v41 = vmul.f32 %v76_v40, %v59_v30 }
  0x47   :  { %v78_v42 = vmul.f32 %v77_v41, %v77_v41 }
  0x49   :  { %v79_v43 = vsub.f32 1.0, %v78_v42 }
  0x4b   :  { %v80_v44 = vmax.f32 %v79_v43, 0.0 }
  0x4d   :  { %131 = vrsqrt.f32 %v80_v44  ;;  %vm83_vm2 = vcmp.eq.f32.partialorder %v80_v44, inf  ;;  %v86_v55 = vand.u32 2147483648, %v80_v44  ;;  %vm85_vm3 = vcmp.eq.f32.partialorder %v80_v44, 0.0 }
  0x4e   :  { %v130_v45 = vpop.eup %129 }
  0x4f   :  { %v64_v47 = vmul.f32 %v130_v45, %v62_v39 }
  0x51   :  { %v66_v48 = vsel %vm65_vm0, %v62_v39, %v64_v47 }
  0x52   :  { %v69_v50 = vsel %vm67_vm1, %v68_v46, %v66_v48 }
  0x53   :  { %v89_v51 = vmul.f32 %v77_v41, %v69_v50 }
  0x55   :  { %v95_v52 = vxor.u32 %v90_v49, %v89_v51 }
  0x57   :  { %v132_v54 = vpop.eup %131  ;;  %v102_v56 = vmul.f32 0.1, %v95_v52 }
  0x58   :  { %v82_v57 = vmul.f32 %v132_v54, %v80_v44 }
  0x59   :  { %v103_v58 = vadd.f32 %v102_v56, %v101_v53 }
  0x5a   :  { %v84_v59 = vsel %vm83_vm2, %v80_v44, %v82_v57 }
  0x5b   :  { %v87_v60 = vsel %vm85_vm3, %v86_v55, %v84_v59  ;;  %104 = vst [vmem:[#allocation5 + $0x8] sm:$0xff] %v103_v58 }
  0x5c   :  { %v88_v61 = vmul.f32 %v87_v60, %v69_v50 }
  0x5e   :  { %v92_v62 = vxor.u32 %v90_v49, %v88_v61 }
  0x60   :  { %v98_v0 = vmul.f32 0.1, %v92_v62 }
  0x62   :  { %v99_v1 = vadd.f32 %v98_v0, %v97_v63 }
  0x64   :  { %100 = vst [vmem:[#allocation5] sm:$0xff] %v99_v1 }
  0x65   :  { %166 = shalt.err (!%p163_p12)
}
  0x66   :  { %s167_s24 = scalar_lea.hbm %s226_s1, 256 }
  0x67   :  { %p168_p13 = scmp.ne.s32.totalorder %s226_s1, %s167_s24  ;;  %p171_p0 = scmp.lt.u32.totalorder %s167_s24, %s226_s1 }
  0x69   :  { %p173_p1 = pnand %p171_p0, %p168_p13 }
  0x6b   :  { %176 = shalt.err (!%p173_p1)
}
  0x6c   :  { %116 = dma.vmem_to_hbm [thread:$0]  %s111_s20, 256, %s226_s1, [#allocation4], %s182_s16, %s182_s16, %s183_s17  }
  0x6d   :  { %179 = dma.done.wait [#allocation4], 256  }
  0x6e   :  { %180 = vsyncadd [#allocation4], 4294967040 }
  0x6f   :  { %120 = vsyncpa [#allocation3], 1 }
  0x70   :  { %121 = vsyncpa [#allocation4], 1 }

</bundles_post_ra>
